<compile_context>
chip_gen: v7x
topology: tpu7x:2x2x1
jax: 0.10.0
libtpu: 0.0.40
codegen_flags: <defaults>
</compile_context>

<pallas_src>
import math
import functools

import jax
import jax.numpy as jnp
from jax import lax
from jax.experimental import pallas as pl
from jax.experimental.pallas import tpu as pltpu


# Contract last dim of lhs with last dim of rhs, i.e. x @ w.T for a PyTorch
# (E_out, E_in) weight, with no explicit transpose materialized.
_DN_LAST_LAST = (((1,), (1,)), ((), ()))


def _pick_block(dim, target):
    """Largest multiple-of-8 block <= target that evenly divides dim (else full dim)."""
    if dim <= target:
        return dim
    b = (target // 8) * 8
    while b >= 8:
        if dim % b == 0:
            return b
        b -= 8
    return dim  # TODO(synk): ragged tails need masked kv handling


# ---------------------------------------------------------------------------
# Kernel A: K/V in-projection (tiled over batch x kv-blocks), head-split output
# ---------------------------------------------------------------------------

def _kv_proj_kernel(k_ref, v_ref, wk_ref, bk_ref, wv_ref, bv_ref,
                    kp_ref, vp_ref, *, nhead, compute_dtype):
    skv, E = k_ref.shape
    D = E // nhead
    cdt = compute_dtype

    def proj(x_ref, w_ref, b_ref):
        p = lax.dot_general(x_ref[...].astype(cdt), w_ref[...], _DN_LAST_LAST,
                            preferred_element_type=jnp.float32)
        return p + b_ref[...].astype(jnp.float32)          # (skv, E) f32

    kproj = proj(k_ref, wk_ref, bk_ref)
    vproj = proj(v_ref, wv_ref, bv_ref)

    # Head split via static lane slices + leading-index stores (layout only).
    for h in range(nhead):
        lo = h * D
        kp_ref[h] = kproj[:, lo:lo + D].astype(cdt)
        vp_ref[h] = vproj[:, lo:lo + D].astype(cdt)


# ---------------------------------------------------------------------------
# Kernel B: flash-style attention with fused Q-projection and fused out_proj
# grid = (batch, q-block, kv-block); kv is the trailing "arbitrary" axis.
# ---------------------------------------------------------------------------

def _flash_mha_kernel(q_ref, k_ref, v_ref, wq_ref, bq_ref, wo_ref, bo_ref,
                      o_ref, qh_sc, m_sc, l_sc, acc_sc, ctx_sc,
                      *, nhead, compute_dtype):
    lq, E = q_ref.shape
    D = E // nhead
    cdt = compute_dtype
    kv = pl.program_id(2)

    @pl.when(kv == 0)
    def _init():
        # Fused Q projection: 1/sqrt(D) already folded into wq/bq by the wrapper.
        qp = lax.dot_general(q_ref[...].astype(cdt), wq_ref[...], _DN_LAST_LAST,
                             preferred_element_type=jnp.float32)
        qp = qp + bq_ref[...].astype(jnp.float32)           # (lq, E) f32
        for h in range(nhead):                              # layout-only head split
            qh_sc[h] = qp[:, h * D:(h + 1) * D].astype(cdt)
        m_sc[...] = jnp.full(m_sc.shape, -jnp.inf, m_sc.dtype)
        l_sc[...] = jnp.zeros(l_sc.shape, l_sc.dtype)
        acc_sc[...] = jnp.zeros(acc_sc.shape, acc_sc.dtype)

    # Online-softmax update for this kv tile; all heads batched through the MXU.
    s = jnp.einsum('hqd,hkd->hqk', qh_sc[...], k_ref[...],
                   preferred_element_type=jnp.float32)       # (H, lq, skv) f32
    m_prev = m_sc[...]
    m_new = jnp.maximum(m_prev, s.max(axis=-1, keepdims=True))
    alpha = jnp.exp(m_prev - m_new)
    p = jnp.exp(s - m_new)                                   # unnormalized probs (f32)
    l_sc[...] = alpha * l_sc[...] + p.sum(axis=-1, keepdims=True)
    acc_sc[...] = alpha * acc_sc[...] + jnp.einsum(
        'hqk,hkd->hqd', p.astype(cdt), v_ref[...],
        preferred_element_type=jnp.float32)
    m_sc[...] = m_new

    @pl.when(kv == pl.num_programs(2) - 1)
    def _finalize():
        # Normalize AFTER the PV matmul; merge heads into a lane-dense (lq, E) slab
        # in VMEM scratch at static lane offsets, then fused out_proj.
        for h in range(nhead):
            inv_l = pl.reciprocal(l_sc[h], approx=True)      # (lq, 1), EUP
            ctx_sc[:, h * D:(h + 1) * D] = (acc_sc[h] * inv_l).astype(cdt)
        out = lax.dot_general(ctx_sc[...], wo_ref[...], _DN_LAST_LAST,
                              preferred_element_type=jnp.float32)
        o_ref[...] = (out + bo_ref[...].astype(jnp.float32)).astype(o_ref.dtype)


# ---------------------------------------------------------------------------
# Wrapper
# ---------------------------------------------------------------------------

def multi_head_attention(q, k, v, params, nhead, attn_mask=None,
                         compute_dtype=jnp.float32,
                         q_block=512, kv_block=512):
    """Forward of nn.MultiheadAttention(d_model, nhead) with key_padding_mask=None.

    q: (L, N, E); k, v: (S, N, E). Returns (L, N, E) = attention(q, k, v)[0].
    """
    assert attn_mask is None, "TODO(synk): key_padding_mask path not implemented"
    L, N, E = q.shape
    S = k.shape[0]
    assert v.shape[0] == S and k.shape[-1] == E and v.shape[-1] == E
    assert E % nhead == 0
    D = E // nhead
    out_dtype = q.dtype
    cdt = compute_dtype

    # Layout plumbing: batch-leading so kernels see lane-dense (seq, E) slabs.
    qb = jnp.transpose(q, (1, 0, 2))    # (N, L, E)
    kb = jnp.transpose(k, (1, 0, 2))    # (N, S, E)
    vb = jnp.transpose(v, (1, 0, 2))

    # Weights kept in PyTorch (E_out, E_in) layout; fold 1/sqrt(D) into w_q / b_q.
    scale = 1.0 / math.sqrt(D)
    w_in = jnp.asarray(params["in_proj_weight"])
    b_in = jnp.asarray(params["in_proj_bias"])
    w_q = (w_in[0:E] * scale).astype(cdt)
    b_q = (b_in[0:E] * scale).astype(jnp.float32).reshape(1, E)
    w_k = w_in[E:2 * E].astype(cdt)
    b_k = b_in[E:2 * E].astype(jnp.float32).reshape(1, E)
    w_v = w_in[2 * E:3 * E].astype(cdt)
    b_v = b_in[2 * E:3 * E].astype(jnp.float32).reshape(1, E)
    w_o = jnp.asarray(params["out_proj_weight"]).astype(cdt)
    b_o = jnp.asarray(params["out_proj_bias"]).astype(jnp.float32).reshape(1, E)

    lq = _pick_block(L, q_block)
    skv = _pick_block(S, kv_block)
    vmem_limit = 64 * 1024 * 1024  # TODO(synk): re-derive tile/VMEM budget for v7x (64 MiB)

    # --- Pass 1: K/V projection (precompute; avoids re-projecting kv per q-block) ---
    kp, vp = pl.pallas_call(
        functools.partial(_kv_proj_kernel, nhead=nhead, compute_dtype=cdt),
        out_shape=(jax.ShapeDtypeStruct((N, nhead, S, D), cdt),
                   jax.ShapeDtypeStruct((N, nhead, S, D), cdt)),
        grid=(N, S // skv),
        in_specs=[
            pl.BlockSpec((None, skv, E), lambda n, s: (n, s, 0)),   # k tile
            pl.BlockSpec((None, skv, E), lambda n, s: (n, s, 0)),   # v tile
            pl.BlockSpec((E, E), lambda n, s: (0, 0)),              # w_k (resident)
            pl.BlockSpec((1, E), lambda n, s: (0, 0)),              # b_k
            pl.BlockSpec((E, E), lambda n, s: (0, 0)),              # w_v
            pl.BlockSpec((1, E), lambda n, s: (0, 0)),              # b_v
        ],
        out_specs=(
            pl.BlockSpec((None, nhead, skv, D), lambda n, s: (n, 0, s, 0)),
            pl.BlockSpec((None, nhead, skv, D), lambda n, s: (n, 0, s, 0)),
        ),
        compiler_params=pltpu.CompilerParams(
            dimension_semantics=("parallel", "parallel"),
            vmem_limit_bytes=vmem_limit),
    )(kb, vb, w_k, b_k, w_v, b_v)

    # --- Pass 2: flash attention (fused Q projection + online softmax + out_proj) ---
    out_nle = pl.pallas_call(
        functools.partial(_flash_mha_kernel, nhead=nhead, compute_dtype=cdt),
        out_shape=jax.ShapeDtypeStruct((N, L, E), out_dtype),
        grid=(N, L // lq, S // skv),
        in_specs=[
            pl.BlockSpec((None, lq, E), lambda n, i, j: (n, i, 0)),            # q tile
            pl.BlockSpec((None, nhead, skv, D), lambda n, i, j: (n, 0, j, 0)),  # kp tile
            pl.BlockSpec((None, nhead, skv, D), lambda n, i, j: (n, 0, j, 0)),  # vp tile
            pl.BlockSpec((E, E), lambda n, i, j: (0, 0)),   # w_q (scaled, resident)
            pl.BlockSpec((1, E), lambda n, i, j: (0, 0)),   # b_q (scaled)
            pl.BlockSpec((E, E), lambda n, i, j: (0, 0)),   # w_o (resident)
            pl.BlockSpec((1, E), lambda n, i, j: (0, 0)),   # b_o
        ],
        out_specs=pl.BlockSpec((None, lq, E), lambda n, i, j: (n, i, 0)),
        scratch_shapes=[
            pltpu.VMEM((nhead, lq, D), cdt),          # projected, head-split q
            pltpu.VMEM((nhead, lq, 1), jnp.float32),  # running max m
            pltpu.VMEM((nhead, lq, 1), jnp.float32),  # running denom l
            pltpu.VMEM((nhead, lq, D), jnp.float32),  # unnormalized context acc
            pltpu.VMEM((lq, E), cdt),                 # merged-head context slab
        ],
        compiler_params=pltpu.CompilerParams(
            dimension_semantics=("parallel", "parallel", "arbitrary"),
            vmem_limit_bytes=vmem_limit),
    )(qb, kp, vp, w_q, b_q, w_o, b_o)

    return jnp.transpose(out_nle, (1, 0, 2))    # back to (L, N, E)


# ---------------------------------------------------------------------------
# Pure-JAX reference (same math as torch's nn.MultiheadAttention forward)
# ---------------------------------------------------------------------------

def multi_head_attention_ref(q, k, v, params, nhead):
    L, N, E = q.shape
    S = k.shape[0]
    D = E // nhead
    w_in, b_in = params["in_proj_weight"], params["in_proj_bias"]
    w_q, w_k, w_v = w_in[:E], w_in[E:2 * E], w_in[2 * E:]
    b_q, b_k, b_v = b_in[:E], b_in[E:2 * E], b_in[2 * E:]
    qp = q.reshape(L * N, E) @ w_q.T + b_q
    kp = k.reshape(S * N, E) @ w_k.T + b_k
    vp = v.reshape(S * N, E) @ w_v.T + b_v
    qh = qp.reshape(L, N * nhead, D).transpose(1, 0, 2) / math.sqrt(D)
    kh = kp.reshape(S, N * nhead, D).transpose(1, 0, 2)
    vh = vp.reshape(S, N * nhead, D).transpose(1, 0, 2)
    s = jnp.einsum("bld,bsd->bls", qh, kh)
    p = jax.nn.softmax(s, axis=-1)
    ctx = jnp.einsum("bls,bsd->bld", p, vh)
    ctx = ctx.transpose(1, 0, 2).reshape(L * N, E)
    out = ctx @ params["out_proj_weight"].T + params["out_proj_bias"]
    return out.reshape(L, N, E)


# ---------------------------------------------------------------------------
# Main
# ---------------------------------------------------------------------------

if __name__ == "__main__":
    d_model, nhead = 32, 4
    L = S = 128
    N = 2

    key = jax.random.PRNGKey(0)
    k_q, k_k, k_v, k_w1, k_b1, k_w2, k_b2 = jax.random.split(key, 7)

    q = jax.random.normal(k_q, (L, N, d_model), jnp.float32)
    k = jax.random.normal(k_k, (S, N, d_model), jnp.float32)
    v = jax.random.normal(k_v, (S, N, d_model), jnp.float32)

    params = {
        "in_proj_weight": jax.random.normal(k_w1, (3 * d_model, d_model), jnp.float32) * 0.05,
        "in_proj_bias": jax.random.normal(k_b1, (3 * d_model,), jnp.float32) * 0.05,
        "out_proj_weight": jax.random.normal(k_w2, (d_model, d_model), jnp.float32) * 0.05,
        "out_proj_bias": jax.random.normal(k_b2, (d_model,), jnp.float32) * 0.05,
    }

    ref = multi_head_attention_ref(q, k, v, params, nhead)

    # f32 path with small tiles: grid (2 batch, 2 q-blocks, 2 kv-blocks) so the
    # online-softmax multi-step path and the pipelined kv stream are exercised.
    out = multi_head_attention(q, k, v, params, nhead, q_block=64, kv_block=64)
    out = jax.block_until_ready(out)
    assert out.shape == (L, N, d_model)
    assert jnp.allclose(out, ref, atol=2e-3, rtol=2e-3), "f32 path mismatch vs reference"

    # bf16 MXU-operand path (f32 accumulation + f32 softmax), default (full) tiles.
    out_bf16 = multi_head_attention(q, k, v, params, nhead, compute_dtype=jnp.bfloat16)
    out_bf16 = jax.block_until_ready(out_bf16)
    assert jnp.allclose(out_bf16, ref, atol=3e-2, rtol=3e-2), "bf16 path mismatch vs reference"

    print("KERNEL_OK")
</pallas_src>

<mosaic_0001>
module attributes {stable_mosaic.version = 11 : i64} {
  func.func @_kv_proj_kernel(%arg0: i32, %arg1: i32, %arg2: memref<1x64x32xf32, #tpu.memory_space<vmem>>, %arg3: memref<1x64x32xf32, #tpu.memory_space<vmem>>, %arg4: memref<32x32xf32, #tpu.memory_space<vmem>>, %arg5: memref<1x32xf32, #tpu.memory_space<vmem>>, %arg6: memref<32x32xf32, #tpu.memory_space<vmem>>, %arg7: memref<1x32xf32, #tpu.memory_space<vmem>>, %arg8: memref<1x4x64x8xf32, #tpu.memory_space<vmem>>, %arg9: memref<1x4x64x8xf32, #tpu.memory_space<vmem>>) attributes {dimension_semantics = [#tpu.dimension_semantics<parallel>, #tpu.dimension_semantics<parallel>], iteration_bounds = array<i64: 2, 2>, scalar_prefetch = 0 : i64, scratch_operands = 0 : i64, tpu.core_type = #tpu.core_type<tc>, window_params = [{transform_indices = @transform_0, window_bounds = array<i64: 1, 64, 32>}, {transform_indices = @transform_1, window_bounds = array<i64: 1, 64, 32>}, {pipeline_mode = #tpu.pipeline_mode<synchronous>, transform_indices = @transform_2, window_bounds = array<i64: 32, 32>}, {pipeline_mode = #tpu.pipeline_mode<synchronous>, transform_indices = @transform_3, window_bounds = array<i64: 1, 32>}, {pipeline_mode = #tpu.pipeline_mode<synchronous>, transform_indices = @transform_4, window_bounds = array<i64: 32, 32>}, {pipeline_mode = #tpu.pipeline_mode<synchronous>, transform_indices = @transform_5, window_bounds = array<i64: 1, 32>}, {transform_indices = @transform_6, window_bounds = array<i64: 1, 4, 64, 8>}, {transform_indices = @transform_7, window_bounds = array<i64: 1, 4, 64, 8>}]} {
    %c0 = arith.constant 0 : index
    %c0_0 = arith.constant 0 : index
    %c0_1 = arith.constant 0 : index
    %0 = vector.load %arg2[%c0, %c0_0, %c0_1] : memref<1x64x32xf32, #tpu.memory_space<vmem>>, vector<1x64x32xf32>
    %1 = vector.shape_cast %0 : vector<1x64x32xf32> to vector<64x32xf32>
    %c0_2 = arith.constant 0 : index
    %c0_3 = arith.constant 0 : index
    %2 = vector.load %arg4[%c0_2, %c0_3] : memref<32x32xf32, #tpu.memory_space<vmem>>, vector<32x32xf32>
    %cst = arith.constant dense<0.000000e+00> : vector<64x32xf32>
    %3 = tpu.matmul %1, %2, %cst {dimension_numbers = #tpu.dot_dimension_numbers<[1], [1], [0], [0], [0, 0, 1, 0], [], []>} : vector<64x32xf32>, vector<32x32xf32>, vector<64x32xf32> -> vector<64x32xf32>
    %c0_4 = arith.constant 0 : index
    %c0_5 = arith.constant 0 : index
    %4 = vector.load %arg5[%c0_4, %c0_5] : memref<1x32xf32, #tpu.memory_space<vmem>>, vector<1x32xf32>
    %5 = vector.broadcast %4 : vector<1x32xf32> to vector<64x32xf32>
    %6 = arith.addf %3, %5 : vector<64x32xf32>
    %c0_6 = arith.constant 0 : index
    %c0_7 = arith.constant 0 : index
    %c0_8 = arith.constant 0 : index
    %7 = vector.load %arg3[%c0_6, %c0_7, %c0_8] : memref<1x64x32xf32, #tpu.memory_space<vmem>>, vector<1x64x32xf32>
    %8 = vector.shape_cast %7 : vector<1x64x32xf32> to vector<64x32xf32>
    %c0_9 = arith.constant 0 : index
    %c0_10 = arith.constant 0 : index
    %9 = vector.load %arg6[%c0_9, %c0_10] : memref<32x32xf32, #tpu.memory_space<vmem>>, vector<32x32xf32>
    %cst_11 = arith.constant dense<0.000000e+00> : vector<64x32xf32>
    %10 = tpu.matmul %8, %9, %cst_11 {dimension_numbers = #tpu.dot_dimension_numbers<[1], [1], [0], [0], [0, 0, 1, 0], [], []>} : vector<64x32xf32>, vector<32x32xf32>, vector<64x32xf32> -> vector<64x32xf32>
    %c0_12 = arith.constant 0 : index
    %c0_13 = arith.constant 0 : index
    %11 = vector.load %arg7[%c0_12, %c0_13] : memref<1x32xf32, #tpu.memory_space<vmem>>, vector<1x32xf32>
    %12 = vector.broadcast %11 : vector<1x32xf32> to vector<64x32xf32>
    %13 = arith.addf %10, %12 : vector<64x32xf32>
    %14 = vector.extract_strided_slice %6 {offsets = [0, 0], sizes = [64, 8], strides = [1, 1]} : vector<64x32xf32> to vector<64x8xf32>
    %c0_14 = arith.constant 0 : index
    %c0_15 = arith.constant 0 : index
    %c0_16 = arith.constant 0 : index
    %c0_17 = arith.constant 0 : index
    %15 = vector.load %arg8[%c0_14, %c0_15, %c0_16, %c0_17] : memref<1x4x64x8xf32, #tpu.memory_space<vmem>>, vector<1x1x64x8xf32>
    %16 = vector.shape_cast %15 : vector<1x1x64x8xf32> to vector<64x8xf32>
    %17 = vector.shape_cast %14 : vector<64x8xf32> to vector<1x1x64x8xf32>
    tpu.vector_store %arg8[%c0_14, %c0_15, %c0_16, %c0_17], %17 {strides = array<i32>} : memref<1x4x64x8xf32, #tpu.memory_space<vmem>>, vector<1x1x64x8xf32>,
    %18 = vector.extract_strided_slice %13 {offsets = [0, 0], sizes = [64, 8], strides = [1, 1]} : vector<64x32xf32> to vector<64x8xf32>
    %c0_18 = arith.constant 0 : index
    %c0_19 = arith.constant 0 : index
    %c0_20 = arith.constant 0 : index
    %c0_21 = arith.constant 0 : index
    %19 = vector.load %arg9[%c0_18, %c0_19, %c0_20, %c0_21] : memref<1x4x64x8xf32, #tpu.memory_space<vmem>>, vector<1x1x64x8xf32>
    %20 = vector.shape_cast %19 : vector<1x1x64x8xf32> to vector<64x8xf32>
    %21 = vector.shape_cast %18 : vector<64x8xf32> to vector<1x1x64x8xf32>
    tpu.vector_store %arg9[%c0_18, %c0_19, %c0_20, %c0_21], %21 {strides = array<i32>} : memref<1x4x64x8xf32, #tpu.memory_space<vmem>>, vector<1x1x64x8xf32>,
    %22 = vector.extract_strided_slice %6 {offsets = [0, 8], sizes = [64, 8], strides = [1, 1]} : vector<64x32xf32> to vector<64x8xf32>
    %c0_22 = arith.constant 0 : index
    %c1 = arith.constant 1 : index
    %c0_23 = arith.constant 0 : index
    %c0_24 = arith.constant 0 : index
    %23 = vector.load %arg8[%c0_22, %c1, %c0_23, %c0_24] : memref<1x4x64x8xf32, #tpu.memory_space<vmem>>, vector<1x1x64x8xf32>
    %24 = vector.shape_cast %23 : vector<1x1x64x8xf32> to vector<64x8xf32>
    %25 = vector.shape_cast %22 : vector<64x8xf32> to vector<1x1x64x8xf32>
    tpu.vector_store %arg8[%c0_22, %c1, %c0_23, %c0_24], %25 {strides = array<i32>} : memref<1x4x64x8xf32, #tpu.memory_space<vmem>>, vector<1x1x64x8xf32>,
    %26 = vector.extract_strided_slice %13 {offsets = [0, 8], sizes = [64, 8], strides = [1, 1]} : vector<64x32xf32> to vector<64x8xf32>
    %c0_25 = arith.constant 0 : index
    %c1_26 = arith.constant 1 : index
    %c0_27 = arith.constant 0 : index
    %c0_28 = arith.constant 0 : index
    %27 = vector.load %arg9[%c0_25, %c1_26, %c0_27, %c0_28] : memref<1x4x64x8xf32, #tpu.memory_space<vmem>>, vector<1x1x64x8xf32>
    %28 = vector.shape_cast %27 : vector<1x1x64x8xf32> to vector<64x8xf32>
    %29 = vector.shape_cast %26 : vector<64x8xf32> to vector<1x1x64x8xf32>
    tpu.vector_store %arg9[%c0_25, %c1_26, %c0_27, %c0_28], %29 {strides = array<i32>} : memref<1x4x64x8xf32, #tpu.memory_space<vmem>>, vector<1x1x64x8xf32>,
    %30 = vector.extract_strided_slice %6 {offsets = [0, 16], sizes = [64, 8], strides = [1, 1]} : vector<64x32xf32> to vector<64x8xf32>
    %c0_29 = arith.constant 0 : index
    %c2 = arith.constant 2 : index
    %c0_30 = arith.constant 0 : index
    %c0_31 = arith.constant 0 : index
    %31 = vector.load %arg8[%c0_29, %c2, %c0_30, %c0_31] : memref<1x4x64x8xf32, #tpu.memory_space<vmem>>, vector<1x1x64x8xf32>
    %32 = vector.shape_cast %31 : vector<1x1x64x8xf32> to vector<64x8xf32>
    %33 = vector.shape_cast %30 : vector<64x8xf32> to vector<1x1x64x8xf32>
    tpu.vector_store %arg8[%c0_29, %c2, %c0_30, %c0_31], %33 {strides = array<i32>} : memref<1x4x64x8xf32, #tpu.memory_space<vmem>>, vector<1x1x64x8xf32>,
    %34 = vector.extract_strided_slice %13 {offsets = [0, 16], sizes = [64, 8], strides = [1, 1]} : vector<64x32xf32> to vector<64x8xf32>
    %c0_32 = arith.constant 0 : index
    %c2_33 = arith.constant 2 : index
    %c0_34 = arith.constant 0 : index
    %c0_35 = arith.constant 0 : index
    %35 = vector.load %arg9[%c0_32, %c2_33, %c0_34, %c0_35] : memref<1x4x64x8xf32, #tpu.memory_space<vmem>>, vector<1x1x64x8xf32>
    %36 = vector.shape_cast %35 : vector<1x1x64x8xf32> to vector<64x8xf32>
    %37 = vector.shape_cast %34 : vector<64x8xf32> to vector<1x1x64x8xf32>
    tpu.vector_store %arg9[%c0_32, %c2_33, %c0_34, %c0_35], %37 {strides = array<i32>} : memref<1x4x64x8xf32, #tpu.memory_space<vmem>>, vector<1x1x64x8xf32>,
    %38 = vector.extract_strided_slice %6 {offsets = [0, 24], sizes = [64, 8], strides = [1, 1]} : vector<64x32xf32> to vector<64x8xf32>
    %c0_36 = arith.constant 0 : index
    %c3 = arith.constant 3 : index
    %c0_37 = arith.constant 0 : index
    %c0_38 = arith.constant 0 : index
    %39 = vector.load %arg8[%c0_36, %c3, %c0_37, %c0_38] : memref<1x4x64x8xf32, #tpu.memory_space<vmem>>, vector<1x1x64x8xf32>
    %40 = vector.shape_cast %39 : vector<1x1x64x8xf32> to vector<64x8xf32>
    %41 = vector.shape_cast %38 : vector<64x8xf32> to vector<1x1x64x8xf32>
    tpu.vector_store %arg8[%c0_36, %c3, %c0_37, %c0_38], %41 {strides = array<i32>} : memref<1x4x64x8xf32, #tpu.memory_space<vmem>>, vector<1x1x64x8xf32>,
    %42 = vector.extract_strided_slice %13 {offsets = [0, 24], sizes = [64, 8], strides = [1, 1]} : vector<64x32xf32> to vector<64x8xf32>
    %c0_39 = arith.constant 0 : index
    %c3_40 = arith.constant 3 : index
    %c0_41 = arith.constant 0 : index
    %c0_42 = arith.constant 0 : index
    %43 = vector.load %arg9[%c0_39, %c3_40, %c0_41, %c0_42] : memref<1x4x64x8xf32, #tpu.memory_space<vmem>>, vector<1x1x64x8xf32>
    %44 = vector.shape_cast %43 : vector<1x1x64x8xf32> to vector<64x8xf32>
    %45 = vector.shape_cast %42 : vector<64x8xf32> to vector<1x1x64x8xf32>
    tpu.vector_store %arg9[%c0_39, %c3_40, %c0_41, %c0_42], %45 {strides = array<i32>} : memref<1x4x64x8xf32, #tpu.memory_space<vmem>>, vector<1x1x64x8xf32>,
    return
  }
  func.func @transform_0(%arg0: i32, %arg1: i32) -> (i32, i32, i32) {
    %c0_i32 = arith.constant 0 : i32
    %c0_i32_0 = arith.constant 0 : i32
    return %arg0, %arg1, %c0_i32 : i32, i32, i32
  }
  func.func @transform_1(%arg0: i32, %arg1: i32) -> (i32, i32, i32) {
    %c0_i32 = arith.constant 0 : i32
    %c0_i32_0 = arith.constant 0 : i32
    return %arg0, %arg1, %c0_i32 : i32, i32, i32
  }
  func.func @transform_2(%arg0: i32, %arg1: i32) -> (i32, i32) {
    %c0_i32 = arith.constant 0 : i32
    %c0_i32_0 = arith.constant 0 : i32
    %c0_i32_1 = arith.constant 0 : i32
    return %c0_i32, %c0_i32_0 : i32, i32
  }
  func.func @transform_3(%arg0: i32, %arg1: i32) -> (i32, i32) {
    %c0_i32 = arith.constant 0 : i32
    %c0_i32_0 = arith.constant 0 : i32
    %c0_i32_1 = arith.constant 0 : i32
    return %c0_i32, %c0_i32_0 : i32, i32
  }
  func.func @transform_4(%arg0: i32, %arg1: i32) -> (i32, i32) {
    %c0_i32 = arith.constant 0 : i32
    %c0_i32_0 = arith.constant 0 : i32
    %c0_i32_1 = arith.constant 0 : i32
    return %c0_i32, %c0_i32_0 : i32, i32
  }
  func.func @transform_5(%arg0: i32, %arg1: i32) -> (i32, i32) {
    %c0_i32 = arith.constant 0 : i32
    %c0_i32_0 = arith.constant 0 : i32
    %c0_i32_1 = arith.constant 0 : i32
    return %c0_i32, %c0_i32_0 : i32, i32
  }
  func.func @transform_6(%arg0: i32, %arg1: i32) -> (i32, i32, i32, i32) {
    %c0_i32 = arith.constant 0 : i32
    %c0_i32_0 = arith.constant 0 : i32
    %c0_i32_1 = arith.constant 0 : i32
    return %arg0, %c0_i32, %arg1, %c0_i32_0 : i32, i32, i32, i32
  }
  func.func @transform_7(%arg0: i32, %arg1: i32) -> (i32, i32, i32, i32) {
    %c0_i32 = arith.constant 0 : i32
    %c0_i32_0 = arith.constant 0 : i32
    %c0_i32_1 = arith.constant 0 : i32
    return %arg0, %c0_i32, %arg1, %c0_i32_0 : i32, i32, i32, i32
  }
}

</mosaic_0001>

<bundles_post_ra>
// kernel: tpu_custom_call.1
= control target key start
LH: loop header
LB: loop body
LE: loop exit
PB: predicated region body
PF: predicated region fallthrough
CT: control target
= control target key end

     0   :  { %s2579_s0 = inlined_call_operand.hbm [shape: f32[2,128,32], index: 0, kind: input, shape index: {}]   ;;  %s2580_s1 = inlined_call_operand.hbm [shape: f32[2,128,32], index: 1, kind: input, shape index: {}]   ;;  %s2581_s2 = inlined_call_operand.hbm [shape: f32[32,32], index: 2, kind: input, shape index: {}]   ;;  %s2582_s3 = inlined_call_operand.hbm [shape: f32[1,32], index: 3, kind: input, shape index: {}]   ;;  %s2583_s4 = inlined_call_operand.hbm [shape: f32[32,32], index: 4, kind: input, shape index: {}]   ;;  %s2584_s5 = inlined_call_operand.hbm [shape: f32[1,32], index: 5, kind: input, shape index: {}]   ;;  %s2585_s6 = inlined_call_operand.hbm [shape: f32[2,4,128,8], index: 6, kind: output, shape index: {0}]   ;;  %s2586_s7 = inlined_call_operand.hbm [shape: f32[2,4,128,8], index: 7, kind: output, shape index: {1}]  }
   0x1   :  { %2596 = sst [smem:[#allocation30_spill]] %s2581_s2 }
   0x2   :  { %2597 = sst [smem:[#allocation31_spill]] %s2582_s3 }
   0x3   :  { %2598 = sst [smem:[#allocation32_spill]] %s2583_s4 }
   0x4   :  { %2599 = sst [smem:[#allocation33_spill]] %s2584_s5 }
   0x5   :  { %2600 = sst [smem:[#allocation34_spill]] %s2585_s6 }
   0x6   :  { %2601 = sst [smem:[#allocation35_spill]] %s2586_s7 }
   0x7   :  { %13 = vsyncpa [#allocation3], 0 }
   0x8   :  { %15 = vsyncpa [#allocation3 + $0x1], 0 }
   0x9   :  { %16 = vsyncpa [#allocation6], 0 }
   0xa   :  { %18 = vsyncpa [#allocation6 + $0x1], 0 }
   0xb   :  { %19 = vsyncpa [#allocation9], 0 }
   0xc   :  { %20 = vsyncpa [#allocation12], 0 }
   0xd   :  { %21 = vsyncpa [#allocation4], 0 }
   0xe   :  { %23 = vsyncpa [#allocation4 + $0x1], 0 }
   0xf   :  { %24 = vsyncpa [#allocation15], 0 }
  0x10   :  { %26 = vsyncpa [#allocation15 + $0x1], 0  ;;  %s1950_s24 = smov 0   ;;  %s1952_s25 = smov 0  }
  0x11   :  { %s1954_s26 = smov 0   ;;  %s1956_s27 = smov 0  }
  0x12   :  { %s1958_s28 = smov 0   ;;  %s1960_s29 = smov 0  }
  0x13   :  { %s1962_s30 = smov 0   ;;  %s1964_s8 = smov 0  }
  0x14 LB: > { %2602 = sst [smem:[#allocation27_spill]] %s1857_s24  ;;  %s1991_s9 = sadd.s32 4294967295, %s1885_s8   ;;  %s1885_s8 = sphi %s1964_s8, %s32_s8   ;;  %s1881_s30 = sphi %s1962_s30, %s2642_s30   ;;  %s1877_s29 = sphi %s1960_s29, %s2641_s29   ;;  %s1873_s28 = sphi %s1958_s28, %s2640_s28   ;;  %s1869_s27 = sphi %s1956_s27, %s2639_s27   ;;  %s1865_s26 = sphi %s1954_s26, %s2638_s26   ;;  %s1861_s25 = sphi %s1952_s25, %s2637_s25   ;;  %s1857_s24 = sphi %s1950_s24, %s2636_s24  }
  0x15   : > { %2603 = sst [smem:[#allocation28_spill]] %s1873_s28  ;;  %s1269_s10 = sadd.s32 4294967294, %s1885_s8  }
  0x16   : > { %p66_p0 = scmp.ne.s32.totalorder %s1861_s25, %s1857_s24  ;;  %p2588_p1 = scmp.eq.s32.totalorder %s1991_s9, 0 }
  0x17   : > { %p210_p3 = scmp.eq.s32.totalorder %s1269_s10, 3  ;;  %p1270_p5 = scmp.ge.s32.totalorder %s1885_s8, 1 }
  0x18   : > { %p2000_p4 = por %p2588_p1, %p66_p0  ;;  %p245_p7 = scmp.lt.s32.totalorder %s1885_s8, 5 }
  0x19   : > { %p2005_p6 = por %p210_p3, %p66_p0  ;;  %s1887_s14 = smov [#allocation7]  }
  0x1a   : > { %s2604_s11 = scalar_select %p2000_p4, 1, 0 }
  0x1b   : > { %s2605_s12 = scalar_select %p2005_p6, 1, 0 }
  0x1c   : > { %p2010_p8 = pnand %p1270_p5, %p245_p7  ;;  %s257_s15 = sshll.u32 %s1887_s14, 4  ;;  %s2014_s15 = int_to_ptr.vmem [resolvable:$true] %s257_s15 }
  0x1d   : > { %2606 = sst [smem:[#allocation29_spill]] %s2605_s12  ;;  %s1888_s17 = smov [#allocation8]  }
  0x1e   : > { %s2607_s13 = scalar_select %p2010_p8, 1, 0 }
  0x1f   : > { %p1501_p9 = pneg %p2010_p8  ;;  %s271_s18 = sshll.u32 %s1888_s17, 4  ;;  %s2024_s18 = int_to_ptr.vmem [resolvable:$true] %s271_s18 }
  0x20   : > { %s1889_s19 = smov [#allocation10]   ;;  %s2609_s2 = sld [smem:[#allocation30_spill]] }
  0x21   : > { %p2020_p10 = pnand %p1501_p9, %p2588_p1  ;;  %s2026_s20 = sshll.u32 %s1889_s19, 4  ;;  %s282_s20 = int_to_ptr.vmem [resolvable:$true] %s2026_s20 }
  0x23   : > { %p2036_p12 = pneg %p2020_p10 }
  0x26   : > { %s1623_s23 = scalar_lea.hbm %s2609_s2, 512 }
  0x27   : > { %p1624_p11 = scmp.ne.s32.totalorder %s2609_s2, %s1623_s23  ;;  %p1630_p3 = scmp.lt.u32.totalorder %s1623_s23, %s2609_s2 }
  0x29   : > { %p1626_p13 = pnand %p2036_p12, %p1624_p11 }
  0x2b   : > { %p1627_p0 = pneg %p1626_p13 }
  0x2d   : > { %p1632_p5 = pnand %p1630_p3, %p1627_p0 }
  0x2f   : > { %1635 = shalt.err (!%p1632_p5)
}
  0x30   : > { %s1636_s21 = scalar_lea.vmem %s2014_s15, 512  ;;  %p1644_p2 = scmp.lt.s32.totalorder %s2014_s15, %s2014_s15 }
  0x31   : > { %p1637_p7 = scmp.ne.s32.totalorder %s2014_s15, %s1636_s21  ;;  %p1645_p6 = scmp.lt.s32.totalorder %s1636_s21, %s1636_s21 }
  0x33   : > { %p1639_p9 = pnand %p1637_p7, %p2036_p12  ;;  %p1646_p11 = por %p1645_p6, %p1644_p2 }
  0x35   : > { %p1640_p1 = pneg %p1639_p9 }
  0x37   : > { %p1647_p13 = pnand %p1646_p11, %p1640_p1 }
  0x39   : > { %1650 = shalt.err (!%p1647_p13)
}
  0x3a   : > { %s2592_s22 = smov 128   ;;  %s2594_s23 = smov 8  }
  0x3b   : > { %1504 = dma.hbm_to_vmem [thread:$0]  (!%p2020_p10), %s2609_s2, 512, %s2014_s15, [#allocation6], %s2592_s22, %s2592_s22, %s2594_s23  }
  0x3c   : > { %s2611_s3 = sld [smem:[#allocation31_spill]] }
  0x42   : > { %s1651_s21 = scalar_lea.hbm %s2611_s3, 16 }
  0x43   : > { %p1652_p1 = scmp.ne.s32.totalorder %s2611_s3, %s1651_s21  ;;  %p1658_p0 = scmp.lt.u32.totalorder %s1651_s21, %s2611_s3 }
  0x45   : > { %p1654_p2 = pnand %p1652_p1, %p2036_p12 }
  0x47   : > { %p1655_p6 = pneg %p1654_p2 }
  0x49   : > { %p1660_p3 = pnand %p1658_p0, %p1655_p6 }
  0x4b   : > { %1663 = shalt.err (!%p1660_p3)
}
  0x4c   : > { %s1664_s15 = scalar_lea.vmem %s2024_s18, 16  ;;  %s1671_s7 = scalar_lea.vmem %s2024_s18, 32 }
  0x4d   : > { %p1665_p5 = scmp.ne.s32.totalorder %s2024_s18, %s1664_s15  ;;  %p1672_p11 = scmp.lt.s32.totalorder %s2024_s18, %s2024_s18 }
  0x4e   : > { %p1673_p13 = scmp.lt.s32.totalorder %s1671_s7, %s1664_s15 }
  0x4f   : > { %p1667_p7 = pnand %p1665_p5, %p2036_p12 }
  0x50   : > { %p1674_p1 = por %p1673_p13, %p1672_p11 }
  0x51   : > { %p1668_p9 = pneg %p1667_p7 }
  0x53   : > { %p1675_p2 = pnand %p1674_p1, %p1668_p9 }
  0x55   : > { %1678 = shalt.err (!%p1675_p2)
}
  0x56   : > { %1507 = dma.hbm_to_vmem [thread:$0]  (!%p2020_p10), %s2611_s3, 16, %s2024_s18, [#allocation9]  }
  0x57   : > { %s2612_s4 = sld [smem:[#allocation32_spill]] }
  0x5d   : > { %s1679_s14 = scalar_lea.hbm %s2612_s4, 512 }
  0x5e   : > { %p1680_p6 = scmp.ne.s32.totalorder %s2612_s4, %s1679_s14  ;;  %p1686_p5 = scmp.lt.u32.totalorder %s1679_s14, %s2612_s4 }
  0x60   : > { %p1682_p0 = pnand %p1680_p6, %p2036_p12 }
  0x62   : > { %p1683_p3 = pneg %p1682_p0 }
  0x64   : > { %p1688_p7 = pnand %p1686_p5, %p1683_p3 }
  0x66   : > { %1691 = shalt.err (!%p1688_p7)
}
  0x67   : > { %s1692_s7 = scalar_lea.vmem %s282_s20, 512  ;;  %p1700_p1 = scmp.lt.s32.totalorder %s282_s20, %s282_s20 }
  0x68   : > { %p1693_p9 = scmp.ne.s32.totalorder %s282_s20, %s1692_s7  ;;  %p1701_p2 = scmp.lt.s32.totalorder %s1692_s7, %s1692_s7 }
  0x6a   : > { %p1695_p11 = pnand %p1693_p9, %p2036_p12  ;;  %p1702_p4 = por %p1701_p2, %p1700_p1 }
  0x6c   : > { %p1696_p13 = pneg %p1695_p11 }
  0x6e   : > { %p1703_p8 = pnand %p1702_p4, %p1696_p13 }
  0x70   : > { %1706 = shalt.err (!%p1703_p8)
}
  0x71   : > { %1510 = dma.hbm_to_vmem [thread:$0]  (!%p2020_p10), %s2612_s4, 512, %s282_s20, [#allocation9], %s2592_s22, %s2592_s22, %s2594_s23  }
  0x72   : > { %s1892_s24 = smov [#allocation11]   ;;  %s2613_s5 = sld [smem:[#allocation33_spill]] }
  0x73   : > { %s295_s28 = sshll.u32 %s1892_s24, 4  ;;  %s296_s28 = int_to_ptr.vmem [resolvable:$true] %s295_s28 }
  0x78   : > { %s1707_s17 = scalar_lea.hbm %s2613_s5, 16 }
  0x79   : > { %p1708_p4 = scmp.ne.s32.totalorder %s2613_s5, %s1707_s17  ;;  %p1714_p0 = scmp.lt.u32.totalorder %s1707_s17, %s2613_s5 }
  0x7b   : > { %p1710_p8 = pnand %p1708_p4, %p2036_p12 }
  0x7d   : > { %p1711_p6 = pneg %p1710_p8 }
  0x7f   : > { %p1716_p3 = pnand %p1714_p0, %p1711_p6 }
  0x81   : > { %1719 = shalt.err (!%p1716_p3)
}
  0x82   : > { %s1720_s20 = scalar_lea.vmem %s296_s28, 16  ;;  %s1727_s18 = scalar_lea.vmem %s296_s28, 32 }
  0x83   : > { %p1721_p5 = scmp.ne.s32.totalorder %s296_s28, %s1720_s20  ;;  %p1728_p11 = scmp.lt.s32.totalorder %s296_s28, %s296_s28 }
  0x84   : > { %p1729_p13 = scmp.lt.s32.totalorder %s1727_s18, %s1720_s20 }
  0x85   : > { %p1723_p7 = pnand %p1721_p5, %p2036_p12 }
  0x86   : > { %p1730_p1 = por %p1729_p13, %p1728_p11 }
  0x87   : > { %p1724_p9 = pneg %p1723_p7 }
  0x89   : > { %p1731_p2 = pnand %p1730_p1, %p1724_p9 }
  0x8b   : > { %1734 = shalt.err (!%p1731_p2)
}
  0x8c   : > { %1513 = dma.hbm_to_vmem [thread:$0]  (!%p2020_p10), %s2613_s5, 16, %s296_s28, [#allocation12]  }
  0x8d   : > { %s41_s12 = sadd.s32 1, %s1877_s29  ;;  %s44_s10 = sadd.s32 1, %s1881_s30 }
  0x8e   : > { %p42_p12 = scmp.ge.s32.totalorder %s41_s12, 2  ;;  %s53_s16 = sadd.s32 1, %s1865_s26 }
  0x8f   : > { %p60_p4 = scmp.ne.s32.totalorder %s1865_s26, %s1861_s25  ;;  %p61_p8 = scmp.eq.s32.totalorder %s1885_s8, 0 }
  0x90   : > { %s2644_s12 = smov (%p42_p12, %s41_s12), 0  ;;  %s2646_s10 = smov (!%p42_p12, %s44_s10), %s1881_s30 }
  0x91   : > { %s49_s14 = ssub.s32 %s1877_s29, %s2644_s12  ;;  %p2135_p6 = por %p61_p8, %p60_p4 }
  0x92   : > { %p46_p10 = scmp.ge.s32.totalorder %s2646_s10, 2  ;;  %p2615_p0 = scmp.eq.s32.totalorder %s1991_s9, 3 }
  0x93   : > { %p1532_p5 = scmp.lt.s32.totalorder %s1885_s8, 4  ;;  %s306_s19 = sand.u32 1, %s1865_s26  }
  0x94   : > { %p2141_p3 = por %p2615_p0, %p60_p4  ;;  %s2648_s10 = smov (%p46_p10, %s2646_s10), 0 }
  0x95   : > { %s1276_s21 = sshll.u32 %s306_s19, 6  ;;  %s48_s15 = ssub.s32 %s1881_s30, %s2648_s10 }
  0x96   : > { %s50_s7 = sor.u32 %s49_s14, %s48_s15  ;;  %s1277_s20 = sshll.u32 %s1877_s29, 3 }
  0x97   : > { %p51_p7 = scmp.eq.s32.totalorder %s50_s7, 0  ;;  %s1278_s18 = sshll.u32 %s1881_s30, 4 }
  0x98   : > { %s316_s6 = sadd.s32 %s1278_s18, %s1277_s20  ;;  %s310_s24 = scalar_lea.vmem [#allocation2], %s1276_s21 }
  0x99   : > { %s319_s22 = sshll.u32 %s310_s24, 4  ;;  %s1279_s2 = sshll.u32 %s316_s6, 7  ;;  %s2156_s22 = int_to_ptr.vmem [resolvable:$true] %s319_s22 }
  0x9a   : > { %s2154_s23 = scalar_select %p51_p7, %s1865_s26, %s53_s16  }
  0x9b   : > { %s2161_s5 = scalar_lea.hbm %s2579_s0, %s1279_s2  ;;  %p2167_p9 = pnand %p1532_p5, %p2135_p6 }
  0x9c   : > { %s2174_s7 = scalar_lea.hbm %s2580_s1, %s1279_s2  ;;  %s333_s3 = scalar_lea.vmem [#allocation5], %s1276_s21 }
  0x9d   : > { %s2176_s4 = sshll.u32 %s333_s3, 4  ;;  %s2178_s17 = scalar_lea.sflag [#allocation3], %s306_s19  ;;  %s2210_s4 = int_to_ptr.vmem [resolvable:$true] %s2176_s4 }
  0x9e   : > { %s1735_s20 = scalar_lea.hbm %s2161_s5, 1024  ;;  %p1737_p13 = pneg %p2167_p9 }
  0x9f   : > { %p1736_p11 = scmp.ne.s32.totalorder %s2161_s5, %s1735_s20  ;;  %s1740_s24 = scalar_lea.hbm %s2579_s0, 4096 }
  0xa0   : > { %p1741_p12 = scmp.lt.u32.totalorder %s2161_s5, %s2579_s0  ;;  %p1742_p4 = scmp.lt.u32.totalorder %s1740_s24, %s1735_s20 }
  0xa1   : > { %p1738_p1 = pnand %p1737_p13, %p1736_p11  ;;  %p1744_p6 = scmp.lt.u32.totalorder %s1735_s20, %s2161_s5 }
  0xa2   : > { %p1743_p8 = por %p1742_p4, %p1741_p12 }
  0xa3   : > { %p1739_p2 = pneg %p1738_p1 }
  0xa4   : > { %p1745_p10 = por %p1744_p6, %p1743_p8 }
  0xa6   : > { %p1746_p0 = pnand %p1745_p10, %p1739_p2 }
  0xa8   : > { %1749 = shalt.err (!%p1746_p0)
}
  0xa9   : > { %s1750_s19 = scalar_lea.vmem %s2156_s22, 1024  ;;  %s1893_s21 = smov [#allocation2]  }
  0xaa   : > { %p1751_p5 = scmp.ne.s32.totalorder %s2156_s22, %s1750_s19  ;;  %s1755_s15 = sshll.u32 %s1893_s21, 4  ;;  %s1756_s15 = int_to_ptr.vmem [resolvable:$false] %s1755_s15 }
  0xab   : > { %s1757_s3 = scalar_lea.vmem %s1756_s15, 2048  ;;  %p1758_p1 = scmp.lt.s32.totalorder %s2156_s22, %s1756_s15 }
  0xac   : > { %p1753_p7 = pnand %p1751_p5, %p1737_p13  ;;  %p1759_p12 = scmp.lt.s32.totalorder %s1757_s3, %s1750_s19 }
  0xae   : > { %p1754_p11 = pneg %p1753_p7  ;;  %p1760_p4 = por %p1759_p12, %p1758_p1 }
  0xb0   : > { %p1761_p8 = pnand %p1760_p4, %p1754_p11 }
  0xb2   : > { %1764 = shalt.err (!%p1761_p8)
}
  0xb3   : > { %s2618_s20 = smov 8   ;;  %s2619_s18 = smov 128  }
  0xb4   : > { %1517 = dma.hbm_to_vmem [thread:$0]  (!%p2167_p9), %s2161_s5, 1024, %s2156_s22, %s2178_s17, %s2619_s18, %s2619_s18, %s2618_s20  }
  0xb5   : > { %s329_s6 = sand.u32 1, %s1885_s8   ;;  %s1765_s16 = scalar_lea.hbm %s2174_s7, 1024 }
  0xb6   : > { %s2213_s24 = scalar_lea.sflag [#allocation6], %s329_s6  ;;  %p1766_p2 = scmp.ne.s32.totalorder %s2174_s7, %s1765_s16 }
  0xb7   : > { %s1770_s21 = scalar_lea.hbm %s2580_s1, 4096  ;;  %p1771_p0 = scmp.lt.u32.totalorder %s2174_s7, %s2580_s1 }
  0xb8   : > { %p1768_p6 = pnand %p1766_p2, %p1737_p13  ;;  %p1772_p5 = scmp.lt.u32.totalorder %s1770_s21, %s1765_s16 }
  0xb9   : > { %p1774_p11 = scmp.lt.u32.totalorder %s1765_s16, %s2174_s7 }
  0xba   : > { %p1769_p10 = pneg %p1768_p6  ;;  %p1773_p7 = por %p1772_p5, %p1771_p0 }
  0xbc   : > { %p1775_p1 = por %p1774_p11, %p1773_p7 }
  0xbe   : > { %p1776_p12 = pnand %p1775_p1, %p1769_p10 }
  0xc0   : > { %1779 = shalt.err (!%p1776_p12)
}
  0xc1   : > { %s1780_s5 = scalar_lea.vmem %s2210_s4, 1024  ;;  %s1894_s22 = smov [#allocation5]  }
  0xc2   : > { %p1781_p4 = scmp.ne.s32.totalorder %s2210_s4, %s1780_s5  ;;  %s1785_s17 = sshll.u32 %s1894_s22, 4  ;;  %s1786_s17 = int_to_ptr.vmem [resolvable:$false] %s1785_s17 }
  0xc3   : > { %s1787_s6 = scalar_lea.vmem %s1786_s17, 2048  ;;  %p1788_p6 = scmp.lt.s32.totalorder %s2210_s4, %s1786_s17 }
  0xc4   : > { %p1783_p8 = pnand %p1781_p4, %p1737_p13  ;;  %p1789_p0 = scmp.lt.s32.totalorder %s1787_s6, %s1780_s5 }
  0xc6   : > { %p1784_p2 = pneg %p1783_p8  ;;  %p1790_p5 = por %p1789_p0, %p1788_p6 }
  0xc8   : > { %p1791_p7 = pnand %p1790_p5, %p1784_p2 }
  0xca   : > { %1794 = shalt.err (!%p1791_p7)
}
  0xcb   : > { %1520 = dma.hbm_to_vmem [thread:$0]  (!%p2167_p9), %s2174_s7, 1024, %s2210_s4, %s2213_s24, %s2619_s18, %s2619_s18, %s2618_s20  }
  0xcc   : > { %p2620_p13 = scmp.ne.s32.totalorder %s2607_s13, 0 }
  0xcd   : > { %s2245_s16 = sand.u32 (!%p2620_p13), 1, %s1861_s25   ;;  %p2621_p10 = scmp.ne.s32.totalorder (!%p2620_p13), %s2604_s11, 0 }
  0xce   : > { %354 = sbr.rel (%p2620_p13) target bundleno = 688 (0x2b0), region = 44  ;;  %s1285_s2 = sshll.u32 (!%p2620_p13), %s2245_s16, 6 }
  0xcf   : > { %s357_s19 = scalar_lea.sflag (!%p2620_p13), [#allocation3], %s2245_s16  ;;  %s2249_s21 = scalar_lea.vmem (!%p2620_p13), [#allocation2], %s1285_s2 }
  0xd5   : > { %1828 = dma.done.wait (%p2621_p10), %s357_s19, 1024  }
  0xd6   : > { %1830 = vsyncadd (%p2621_p10), %s357_s19, 4294966272  ;;  %s365_s14 = sand.u32 1, %s1991_s9   ;;  %s2256_s7 = scalar_lea.vmem [#allocation5], %s1285_s2 }
  0xd7   : > { %s366_s13 = scalar_lea.sflag [#allocation6], %s365_s14 }
  0xd8   : > { %1832 = dma.done.wait (%p2621_p10), %s366_s13, 1024  }
  0xd9   : > { %1834 = vsyncadd (%p2621_p10), %s366_s13, 4294966272  ;;  %p2622_p9 = scmp.eq.s32.totalorder %s1991_s9, 0 }
  0xdb   : > { %1836 = dma.done.wait (%p2622_p9), [#allocation6], 512   ;;  %p2623_p11 = pmov %p2622_p9 }
  0xdc   : > { %p2624_p1 = pmov %p2622_p9 }
  0xdd   : > { %1838 = vsyncadd (%p2623_p11), [#allocation6], 4294966784 }
  0xde   : > { %1840 = dma.done.wait (%p2624_p1), [#allocation9], 528   ;;  %p2625_p12 = pmov %p2624_p1 }
  0xdf   : > { %p2626_p4 = pmov %p2624_p1 }
  0xe0   : > { %1842 = vsyncadd (%p2625_p12), [#allocation9], 4294966768 }
  0xe1   : > { %1844 = dma.done.wait (%p2626_p4), [#allocation12], 16   ;;  %p2627_p8 = pmov %p2624_p1 }
  0xe2   : > { %vm449_vm0 = vcmask 261120   ;;  %v438_v1 = vld [vmem:[#allocation7] sm:$0xff]  ;;  %v439_v2 = vld [vmem:[#allocation7 + $0x8] sm:$0xff]  ;;  %v440_v6 = vld [vmem:[#allocation7 + $0x10] sm:$0xff]  ;;  %s1291_s9 = sshll.u32 %s2245_s16, 8  ;;  %vm751_vm2 = vcmask 64512  }
  0xe3   : > { %1846 = vsyncadd (%p2627_p8), [#allocation12], 4294967280  ;;  %v599_v3 = vld [vmem:[#allocation10] sm:$0xff]  ;;  %v1441_v4 = vpack.c.bf16 %v439_v2, %v438_v1  ;;  %v600_v5 = vld [vmem:[#allocation10 + $0x8] sm:$0xff]  ;;  %s2329_s11 = scalar_lea.vmem [#allocation13], %s1291_s9  ;;  %s1895_s4 = smov 120  }
  0xe4   : > { %vm2276_vm1 = vmpackc.low %vm449_vm0, %vm449_vm0  ;;  %v441_v7 = vld [vmem:[#allocation7 + $0x18] sm:$0xff]  ;;  %v1453_v8 = vpack.c.bf16 %v600_v5, %v599_v3  ;;  %v430_v12 = vld [vmem:[%s2249_s21] sm:$0xff]  ;;  %s2334_s20 = scalar_lea.vmem [#allocation14], %s1291_s9  ;;  %s1896_s18 = smov 112  }
  0xe5   : > { %v1447_v9 = vpack.c.bf16 %v441_v7, %v440_v6  ;;  %v601_v10 = vld [vmem:[#allocation10 + $0x10] sm:$0xff]  ;;  %v602_v11 = vld [vmem:[#allocation10 + $0x18] sm:$0xff]  ;;  %1443 = vmatprep.subr.msk.bf16.mxu0 %vm2276_vm1, %v1441_v4  ;;  %1409 = vmatprep.mubr.msk.f32.mxu0 %vm449_vm0, %v430_v12  ;;  %v431_v15 = vld [vmem:[%s2249_s21 + $0x8] sm:$0xff]  ;;  %s1897_s24 = smov 104   ;;  %s983_s15 = scalar_lea.sflag [#allocation4], %s2245_s16 }
  0xe6   : > { %v1459_v13 = vpack.c.bf16 %v602_v11, %v601_v10  ;;  %v591_v14 = vld [vmem:[%s2256_s7] sm:$0xff]  ;;  %1455 = vmatprep.subr.msk.bf16.mxu1 %vm2276_vm1, %v1453_v8  ;;  %1446 = vmatpush3.bf16.xpose.msk.msra.mxu0 %vm2276_vm1, %v1441_v4  ;;  %v592_v16 = vld [vmem:[%s2256_s7 + $0x8] sm:$0xff]  ;;  %v432_v17 = vld [vmem:[%s2249_s21 + $0x10] sm:$0xff]  ;;  %s988_s3 = scalar_lea.sflag [#allocation15], %s2245_s16 }
  0xe7   : > { %1458 = vmatpush3.bf16.xpose.msk.msra.mxu1 %vm2276_vm1, %v1453_v8  ;;  %1449 = vmatprep.subr.msk.bf16.mxu0 %vm2276_vm1, %v1447_v9  ;;  %v593_v18 = vld [vmem:[%s2256_s7 + $0x10] sm:$0xff]  ;;  %v433_v19 = vld [vmem:[%s2249_s21 + $0x18] sm:$0xff]  ;;  %v434_v21 = vld [vmem:[%s2249_s21 + $0x20] sm:$0xff] }
  0xe8   : > { %1461 = vmatprep.subr.msk.bf16.mxu1 %vm2276_vm1, %v1459_v13  ;;  %1429 = vmatprep.mubr.msk.f32.mxu1 %vm449_vm0, %v591_v14  ;;  %v594_v20 = vld [vmem:[%s2256_s7 + $0x18] sm:$0xff]  ;;  %v595_v22 = vld [vmem:[%s2256_s7 + $0x20] sm:$0xff]  ;;  %v435_v23 = vld [vmem:[%s2249_s21 + $0x28] sm:$0xff] }
  0xe9   : > { %v596_v24 = vld [vmem:[%s2256_s7 + $0x28] sm:$0xff]  ;;  %v436_v25 = vld [vmem:[%s2249_s21 + $0x30] sm:$0xff]  ;;  %v437_v27 = vld [vmem:[%s2249_s21 + $0x38] sm:$0xff] }
  0xea   : > { %v597_v26 = vld [vmem:[%s2256_s7 + $0x30] sm:$0xff]  ;;  %v598_v28 = vld [vmem:[%s2256_s7 + $0x38] sm:$0xff]  ;;  %v1293_v29 = vld [vmem:[#allocation8] ss:$0 sm:$0xff] }
  0xeb   : > { %v1306_v30 = vld [vmem:[#allocation11] ss:$0 sm:$0xff] }
  0xee   : > { %1452 = vmatpush3.bf16.xpose.msk.msra.mxu0 %vm2276_vm1, %v1447_v9 }
  0xef   : > { %1464 = vmatpush3.bf16.xpose.msk.msra.mxu1 %vm2276_vm1, %v1459_v13 }
  0xf5   : > { %1410 = vmatmul.mubr.msk.f32.vlgmr.msra.gmra.mrb[0].mxu0 %vm449_vm0, %v431_v15 }
  0xf6   : > { %1430 = vmatmul.mubr.msk.f32.vlgmr.msra.gmra.mrb[0].mxu1 %vm449_vm0, %v592_v16  ;;  %1412 = vmatprep.mubr.msk.f32.mxu0 %vm449_vm0, %v432_v17 }
  0xf7   : > { %1432 = vmatprep.mubr.msk.f32.mxu1 %vm449_vm0, %v593_v18 }
  0xf9   : > { %1413 = vmatmul.mubr.msk.f32.gmra.mrb[2].mxu0 %vm449_vm0, %v433_v19 }
  0xfa   : > { %1433 = vmatmul.mubr.msk.f32.gmra.mrb[2].mxu1 %vm449_vm0, %v594_v20  ;;  %1415 = vmatprep.mubr.msk.f32.mxu0 %vm449_vm0, %v434_v21 }
  0xfb   : > { %1435 = vmatprep.mubr.msk.f32.mxu1 %vm449_vm0, %v595_v22 }
  0xfd   : > { %1416 = vmatmul.mubr.msk.f32.gmra.mrb[4].mxu0 %vm449_vm0, %v435_v23 }
  0xfe   : > { %1436 = vmatmul.mubr.msk.f32.gmra.mrb[4].mxu1 %vm449_vm0, %v596_v24  ;;  %1418 = vmatprep.mubr.msk.f32.mxu0 %vm449_vm0, %v436_v25 }
  0xff   : > { %1438 = vmatprep.mubr.msk.f32.mxu1 %vm449_vm0, %v597_v26 }
 0x101   : > { %1419 = vmatmul.mubr.msk.f32.gmra.mrb[6].mxu0 %vm449_vm0, %v437_v27 }
 0x102   : > { %1439 = vmatmul.mubr.msk.f32.gmra.mrb[6].mxu1 %vm449_vm0, %v598_v28 }
 0x1c8   : > { %v1411_v31 = vpop.f32.mrb[0].mxu0 }
 0x1c9   : > { %v558_v32 = vadd.f32 %v1411_v31, %v1293_v29  ;;  %v1431_v33 = vpop.f32.mrb[0].mxu1  ;;  %v552_v34 = vpop.f32.mrb[1].mxu0 }
 0x1ca   : > { %v718_v35 = vadd.f32 %v1431_v33, %v1306_v30  ;;  %v553_v36 = vadd.f32 %v1293_v29, %v552_v34  ;;  %v712_v37 = vpop.f32.mrb[1].mxu1 }
 0x1cb   : > { %753 = vst.msk [vmem:[%s2329_s11 + $0x8] sm:$0xff] %vm751_vm2, %v558_v32  ;;  %v713_v38 = vadd.f32 %v1306_v30, %v712_v37  ;;  %778 = vrot.lane.b32.xlu0 %v558_v32, %s1895_s4 }
 0x1cc   : > { %761 = vst.msk [vmem:[%s2334_s20 + $0x8] sm:$0xff] %vm751_vm2, %v718_v35  ;;  %752 = vst.msk [vmem:[%s2329_s11] sm:$0xff] %vm751_vm2, %v553_v36  ;;  %819 = vrot.lane.b32.xlu1 %v718_v35, %s1895_s4  ;;  %v1414_v39 = vpop.f32.mrb[2].mxu0 }
 0x1cd   : > { %760 = vst.msk [vmem:[%s2334_s20] sm:$0xff] %vm751_vm2, %v713_v38  ;;  %v568_v40 = vadd.f32 %v1414_v39, %v1293_v29  ;;  %v562_v41 = vpop.f32.mrb[3].mxu0  ;;  %v1434_v42 = vpop.f32.mrb[2].mxu1 }
 0x1ce   : > { %v563_v43 = vadd.f32 %v1293_v29, %v562_v41  ;;  %v728_v44 = vadd.f32 %v1434_v42, %v1306_v30  ;;  %v722_v45 = vpop.f32.mrb[3].mxu1 }
 0x1cf   : > { %776 = vrot.lane.b32.xlu0 %v553_v36, %s1895_s4  ;;  %755 = vst.msk [vmem:[%s2329_s11 + $0x18] sm:$0xff] %vm751_vm2, %v568_v40  ;;  %v723_v46 = vadd.f32 %v1306_v30, %v722_v45 }
 0x1d0   : > { %852 = vrot.lane.b32.xlu1 %v558_v32, %s1896_s18  ;;  %754 = vst.msk [vmem:[%s2329_s11 + $0x10] sm:$0xff] %vm751_vm2, %v563_v43  ;;  %763 = vst.msk [vmem:[%s2334_s20 + $0x18] sm:$0xff] %vm751_vm2, %v728_v44  ;;  %v1417_v47 = vpop.f32.mrb[4].mxu0 }
 0x1d1   : > { %762 = vst.msk [vmem:[%s2334_s20 + $0x10] sm:$0xff] %vm751_vm2, %v723_v46  ;;  %v578_v48 = vadd.f32 %v1417_v47, %v1293_v29  ;;  %v572_v49 = vpop.f32.mrb[5].mxu0  ;;  %v1437_v50 = vpop.f32.mrb[4].mxu1 }
 0x1d2   : > { %v573_v51 = vadd.f32 %v1293_v29, %v572_v49  ;;  %v738_v52 = vadd.f32 %v1437_v50, %v1306_v30  ;;  %v732_v53 = vpop.f32.mrb[5].mxu1 }
 0x1d3   : > { %817 = vrot.lane.b32.xlu0 %v713_v38, %s1895_s4  ;;  %757 = vst.msk [vmem:[%s2329_s11 + $0x28] sm:$0xff] %vm751_vm2, %v578_v48  ;;  %v733_v54 = vadd.f32 %v1306_v30, %v732_v53 }
 0x1d4   : > { %885 = vrot.lane.b32.xlu1 %v718_v35, %s1896_s18  ;;  %756 = vst.msk [vmem:[%s2329_s11 + $0x20] sm:$0xff] %vm751_vm2, %v573_v51  ;;  %765 = vst.msk [vmem:[%s2334_s20 + $0x28] sm:$0xff] %vm751_vm2, %v738_v52  ;;  %v1420_v55 = vpop.f32.mrb[6].mxu0 }
 0x1d5   : > { %764 = vst.msk [vmem:[%s2334_s20 + $0x20] sm:$0xff] %vm751_vm2, %v733_v54  ;;  %v588_v56 = vadd.f32 %v1420_v55, %v1293_v29  ;;  %v582_v57 = vpop.f32.mrb[7].mxu0  ;;  %v1440_v58 = vpop.f32.mrb[6].mxu1 }
 0x1d6   : > { %v583_v59 = vadd.f32 %v1293_v29, %v582_v57  ;;  %v748_v60 = vadd.f32 %v1440_v58, %v1306_v30  ;;  %v742_v61 = vpop.f32.mrb[7].mxu1 }
 0x1d7   : > { %850 = vrot.lane.b32.xlu0 %v553_v36, %s1896_s18  ;;  %759 = vst.msk [vmem:[%s2329_s11 + $0x38] sm:$0xff] %vm751_vm2, %v588_v56  ;;  %v743_v62 = vadd.f32 %v1306_v30, %v742_v61 }
 0x1d8   : > { %918 = vrot.lane.b32.xlu1 %v558_v32, %s1897_s24  ;;  %758 = vst.msk [vmem:[%s2329_s11 + $0x30] sm:$0xff] %vm751_vm2, %v583_v59  ;;  %767 = vst.msk [vmem:[%s2334_s20 + $0x38] sm:$0xff] %vm751_vm2, %v748_v60 }
 0x1d9   : > { %766 = vst.msk [vmem:[%s2334_s20 + $0x30] sm:$0xff] %vm751_vm2, %v743_v62 }
 0x1db   : > { %883 = vrot.lane.b32.xlu0 %v713_v38, %s1896_s18 }
 0x1dc   : > { %951 = vrot.lane.b32.xlu1 %v718_v35, %s1897_s24 }
 0x1df   : > { %916 = vrot.lane.b32.xlu0 %v553_v36, %s1897_s24 }
 0x1e0   : > { %782 = vrot.lane.b32.xlu1 %v568_v40, %s1895_s4 }
 0x1e3   : > { %949 = vrot.lane.b32.xlu0 %v713_v38, %s1897_s24 }
 0x1e4   : > { %823 = vrot.lane.b32.xlu1 %v728_v44, %s1895_s4 }
 0x1e7   : > { %821 = vrot.lane.b32.xlu0 %v723_v46, %s1895_s4 }
 0x1e8   : > { %856 = vrot.lane.b32.xlu1 %v568_v40, %s1896_s18 }
 0x1eb   : > { %854 = vrot.lane.b32.xlu0 %v563_v43, %s1896_s18 }
 0x1ec   : > { %889 = vrot.lane.b32.xlu1 %v728_v44, %s1896_s18 }
 0x1ef   : > { %887 = vrot.lane.b32.xlu0 %v723_v46, %s1896_s18 }
 0x1f0   : > { %922 = vrot.lane.b32.xlu1 %v568_v40, %s1897_s24 }
 0x1f3   : > { %920 = vrot.lane.b32.xlu0 %v563_v43, %s1897_s24 }
 0x1f4   : > { %955 = vrot.lane.b32.xlu1 %v728_v44, %s1897_s24 }
 0x1f7   : > { %953 = vrot.lane.b32.xlu0 %v723_v46, %s1897_s24 }
 0x1f8   : > { %780 = vrot.lane.b32.xlu1 %v563_v43, %s1895_s4 }
 0x1fb   : > { %784 = vrot.lane.b32.xlu0 %v573_v51, %s1895_s4 }
 0x1fc   : > { %786 = vrot.lane.b32.xlu1 %v578_v48, %s1895_s4 }
 0x1ff   : > { %825 = vrot.lane.b32.xlu0 %v733_v54, %s1895_s4 }
 0x200   : > { %827 = vrot.lane.b32.xlu1 %v738_v52, %s1895_s4 }
 0x203   : > { %858 = vrot.lane.b32.xlu0 %v573_v51, %s1896_s18 }
 0x204   : > { %860 = vrot.lane.b32.xlu1 %v578_v48, %s1896_s18 }
 0x207   : > { %891 = vrot.lane.b32.xlu0 %v733_v54, %s1896_s18 }
 0x208   : > { %893 = vrot.lane.b32.xlu1 %v738_v52, %s1896_s18 }
 0x20b   : > { %924 = vrot.lane.b32.xlu0 %v573_v51, %s1897_s24 }
 0x20c   : > { %926 = vrot.lane.b32.xlu1 %v578_v48, %s1897_s24 }
 0x20f   : > { %957 = vrot.lane.b32.xlu0 %v733_v54, %s1897_s24 }
 0x210   : > { %959 = vrot.lane.b32.xlu1 %v738_v52, %s1897_s24 }
 0x213   : > { %788 = vrot.lane.b32.xlu0 %v583_v59, %s1895_s4 }
 0x214   : > { %790 = vrot.lane.b32.xlu1 %v588_v56, %s1895_s4 }
 0x217   : > { %829 = vrot.lane.b32.xlu0 %v743_v62, %s1895_s4 }
 0x218   : > { %831 = vrot.lane.b32.xlu1 %v748_v60, %s1895_s4 }
 0x21b   : > { %862 = vrot.lane.b32.xlu0 %v583_v59, %s1896_s18 }
 0x21c   : > { %864 = vrot.lane.b32.xlu1 %v588_v56, %s1896_s18 }
 0x21f   : > { %895 = vrot.lane.b32.xlu0 %v743_v62, %s1896_s18 }
 0x220   : > { %897 = vrot.lane.b32.xlu1 %v748_v60, %s1896_s18 }
 0x223   : > { %928 = vrot.lane.b32.xlu0 %v583_v59, %s1897_s24 }
 0x224   : > { %930 = vrot.lane.b32.xlu1 %v588_v56, %s1897_s24 }
 0x227   : > { %961 = vrot.lane.b32.xlu0 %v743_v62, %s1897_s24 }
 0x228   : > { %963 = vrot.lane.b32.xlu1 %v748_v60, %s1897_s24 }
 0x23d   : > { %v779_v63 = vpop.permute.xlu0 %778 }
 0x23e   : > { %v820_v0 = vpop.permute.xlu1 %819  ;;  %1320 = vst.msk [vmem:[%s2329_s11 + $0x48] sm:$0xff] %vm751_vm2, %v779_v63 }
 0x23f   : > { %1328 = vst.msk [vmem:[%s2334_s20 + $0x48] sm:$0xff] %vm751_vm2, %v820_v0 }
 0x241   : > { %v777_v1 = vpop.permute.xlu0 %776 }
 0x242   : > { %v853_v2 = vpop.permute.xlu1 %852  ;;  %1319 = vst.msk [vmem:[%s2329_s11 + $0x40] sm:$0xff] %vm751_vm2, %v777_v1 }
 0x243   : > { %1336 = vst.msk [vmem:[%s2329_s11 + $0x88] sm:$0xff] %vm751_vm2, %v853_v2 }
 0x245   : > { %v818_v3 = vpop.permute.xlu0 %817 }
 0x246   : > { %v886_v4 = vpop.permute.xlu1 %885  ;;  %1327 = vst.msk [vmem:[%s2334_s20 + $0x40] sm:$0xff] %vm751_vm2, %v818_v3 }
 0x247   : > { %1344 = vst.msk [vmem:[%s2334_s20 + $0x88] sm:$0xff] %vm751_vm2, %v886_v4 }
 0x249   : > { %v851_v5 = vpop.permute.xlu0 %850 }
 0x24a   : > { %v919_v6 = vpop.permute.xlu1 %918  ;;  %1335 = vst.msk [vmem:[%s2329_s11 + $0x80] sm:$0xff] %vm751_vm2, %v851_v5 }
 0x24b   : > { %1352 = vst.msk [vmem:[%s2329_s11 + $0xc8] sm:$0xff] %vm751_vm2, %v919_v6 }
 0x24d   : > { %v884_v7 = vpop.permute.xlu0 %883 }
 0x24e   : > { %v952_v8 = vpop.permute.xlu1 %951  ;;  %1343 = vst.msk [vmem:[%s2334_s20 + $0x80] sm:$0xff] %vm751_vm2, %v884_v7 }
 0x24f   : > { %1360 = vst.msk [vmem:[%s2334_s20 + $0xc8] sm:$0xff] %vm751_vm2, %v952_v8 }
 0x251   : > { %v917_v9 = vpop.permute.xlu0 %916 }
 0x252   : > { %v783_v10 = vpop.permute.xlu1 %782  ;;  %1351 = vst.msk [vmem:[%s2329_s11 + $0xc0] sm:$0xff] %vm751_vm2, %v917_v9 }
 0x253   : > { %1322 = vst.msk [vmem:[%s2329_s11 + $0x58] sm:$0xff] %vm751_vm2, %v783_v10 }
 0x255   : > { %v950_v11 = vpop.permute.xlu0 %949 }
 0x256   : > { %v824_v12 = vpop.permute.xlu1 %823  ;;  %1359 = vst.msk [vmem:[%s2334_s20 + $0xc0] sm:$0xff] %vm751_vm2, %v950_v11 }
 0x257   : > { %1330 = vst.msk [vmem:[%s2334_s20 + $0x58] sm:$0xff] %vm751_vm2, %v824_v12 }
 0x259   : > { %v822_v13 = vpop.permute.xlu0 %821 }
 0x25a   : > { %v857_v14 = vpop.permute.xlu1 %856  ;;  %1329 = vst.msk [vmem:[%s2334_s20 + $0x50] sm:$0xff] %vm751_vm2, %v822_v13 }
 0x25b   : > { %1338 = vst.msk [vmem:[%s2329_s11 + $0x98] sm:$0xff] %vm751_vm2, %v857_v14 }
 0x25d   : > { %v855_v15 = vpop.permute.xlu0 %854 }
 0x25e   : > { %v890_v16 = vpop.permute.xlu1 %889  ;;  %1337 = vst.msk [vmem:[%s2329_s11 + $0x90] sm:$0xff] %vm751_vm2, %v855_v15 }
 0x25f   : > { %1346 = vst.msk [vmem:[%s2334_s20 + $0x98] sm:$0xff] %vm751_vm2, %v890_v16 }
 0x261   : > { %v888_v17 = vpop.permute.xlu0 %887 }
 0x262   : > { %v923_v18 = vpop.permute.xlu1 %922  ;;  %1345 = vst.msk [vmem:[%s2334_s20 + $0x90] sm:$0xff] %vm751_vm2, %v888_v17 }
 0x263   : > { %1354 = vst.msk [vmem:[%s2329_s11 + $0xd8] sm:$0xff] %vm751_vm2, %v923_v18 }
 0x265   : > { %v921_v19 = vpop.permute.xlu0 %920 }
 0x266   : > { %v956_v20 = vpop.permute.xlu1 %955  ;;  %1353 = vst.msk [vmem:[%s2329_s11 + $0xd0] sm:$0xff] %vm751_vm2, %v921_v19 }
 0x267   : > { %1362 = vst.msk [vmem:[%s2334_s20 + $0xd8] sm:$0xff] %vm751_vm2, %v956_v20 }
 0x269   : > { %v954_v21 = vpop.permute.xlu0 %953 }
 0x26a   : > { %v781_v22 = vpop.permute.xlu1 %780  ;;  %1361 = vst.msk [vmem:[%s2334_s20 + $0xd0] sm:$0xff] %vm751_vm2, %v954_v21 }
 0x26b   : > { %1321 = vst.msk [vmem:[%s2329_s11 + $0x50] sm:$0xff] %vm751_vm2, %v781_v22 }
 0x26d   : > { %v785_v23 = vpop.permute.xlu0 %784 }
 0x26e   : > { %v787_v24 = vpop.permute.xlu1 %786  ;;  %1323 = vst.msk [vmem:[%s2329_s11 + $0x60] sm:$0xff] %vm751_vm2, %v785_v23 }
 0x26f   : > { %1324 = vst.msk [vmem:[%s2329_s11 + $0x68] sm:$0xff] %vm751_vm2, %v787_v24 }
 0x271   : > { %v826_v25 = vpop.permute.xlu0 %825 }
 0x272   : > { %v828_v26 = vpop.permute.xlu1 %827  ;;  %1331 = vst.msk [vmem:[%s2334_s20 + $0x60] sm:$0xff] %vm751_vm2, %v826_v25 }
 0x273   : > { %1332 = vst.msk [vmem:[%s2334_s20 + $0x68] sm:$0xff] %vm751_vm2, %v828_v26 }
 0x275   : > { %v859_v27 = vpop.permute.xlu0 %858 }
 0x276   : > { %v861_v28 = vpop.permute.xlu1 %860  ;;  %1339 = vst.msk [vmem:[%s2329_s11 + $0xa0] sm:$0xff] %vm751_vm2, %v859_v27 }
 0x277   : > { %1340 = vst.msk [vmem:[%s2329_s11 + $0xa8] sm:$0xff] %vm751_vm2, %v861_v28 }
 0x279   : > { %v892_v29 = vpop.permute.xlu0 %891 }
 0x27a   : > { %v894_v30 = vpop.permute.xlu1 %893  ;;  %1347 = vst.msk [vmem:[%s2334_s20 + $0xa0] sm:$0xff] %vm751_vm2, %v892_v29 }
 0x27b   : > { %1348 = vst.msk [vmem:[%s2334_s20 + $0xa8] sm:$0xff] %vm751_vm2, %v894_v30 }
 0x27d   : > { %v925_v31 = vpop.permute.xlu0 %924 }
 0x27e   : > { %v927_v32 = vpop.permute.xlu1 %926  ;;  %1355 = vst.msk [vmem:[%s2329_s11 + $0xe0] sm:$0xff] %vm751_vm2, %v925_v31 }
 0x27f   : > { %1356 = vst.msk [vmem:[%s2329_s11 + $0xe8] sm:$0xff] %vm751_vm2, %v927_v32 }
 0x281   : > { %v958_v33 = vpop.permute.xlu0 %957 }
 0x282   : > { %v960_v34 = vpop.permute.xlu1 %959  ;;  %1363 = vst.msk [vmem:[%s2334_s20 + $0xe0] sm:$0xff] %vm751_vm2, %v958_v33 }
 0x283   : > { %1364 = vst.msk [vmem:[%s2334_s20 + $0xe8] sm:$0xff] %vm751_vm2, %v960_v34 }
 0x285   : > { %v789_v35 = vpop.permute.xlu0 %788 }
 0x286   : > { %v791_v36 = vpop.permute.xlu1 %790  ;;  %1325 = vst.msk [vmem:[%s2329_s11 + $0x70] sm:$0xff] %vm751_vm2, %v789_v35 }
 0x287   : > { %1326 = vst.msk [vmem:[%s2329_s11 + $0x78] sm:$0xff] %vm751_vm2, %v791_v36 }
 0x289   : > { %v830_v37 = vpop.permute.xlu0 %829 }
 0x28a   : > { %v832_v38 = vpop.permute.xlu1 %831  ;;  %1333 = vst.msk [vmem:[%s2334_s20 + $0x70] sm:$0xff] %vm751_vm2, %v830_v37 }
 0x28b   : > { %1334 = vst.msk [vmem:[%s2334_s20 + $0x78] sm:$0xff] %vm751_vm2, %v832_v38 }
 0x28d   : > { %v863_v39 = vpop.permute.xlu0 %862 }
 0x28e   : > { %v865_v40 = vpop.permute.xlu1 %864  ;;  %1341 = vst.msk [vmem:[%s2329_s11 + $0xb0] sm:$0xff] %vm751_vm2, %v863_v39 }
 0x28f   : > { %1342 = vst.msk [vmem:[%s2329_s11 + $0xb8] sm:$0xff] %vm751_vm2, %v865_v40 }
 0x291   : > { %v896_v41 = vpop.permute.xlu0 %895 }
 0x292   : > { %v898_v42 = vpop.permute.xlu1 %897  ;;  %1349 = vst.msk [vmem:[%s2334_s20 + $0xb0] sm:$0xff] %vm751_vm2, %v896_v41 }
 0x293   : > { %1350 = vst.msk [vmem:[%s2334_s20 + $0xb8] sm:$0xff] %vm751_vm2, %v898_v42 }
 0x295   : > { %v929_v43 = vpop.permute.xlu0 %928 }
 0x296   : > { %v931_v44 = vpop.permute.xlu1 %930  ;;  %1357 = vst.msk [vmem:[%s2329_s11 + $0xf0] sm:$0xff] %vm751_vm2, %v929_v43 }
 0x297   : > { %1358 = vst.msk [vmem:[%s2329_s11 + $0xf8] sm:$0xff] %vm751_vm2, %v931_v44 }
 0x299   : > { %v962_v45 = vpop.permute.xlu0 %961 }
 0x29a   : > { %v964_v46 = vpop.permute.xlu1 %963  ;;  %1365 = vst.msk [vmem:[%s2334_s20 + $0xf0] sm:$0xff] %vm751_vm2, %v962_v45 }
 0x29b   : > { %1366 = vst.msk [vmem:[%s2334_s20 + $0xf8] sm:$0xff] %vm751_vm2, %v964_v46 }
 0x29c   : > { %s2630_s5 = sld [smem:[#allocation28_spill]]  ;;  %s1369_s22 = sshll.u32 %s1869_s27, 3 }
 0x29d   : > { %s1019_s2 = sshll.u32 %s2329_s11, 4  ;;  %s2631_s13 = sld [smem:[#allocation34_spill]]  ;;  %s1020_s2 = int_to_ptr.vmem [resolvable:$true] %s1019_s2 }
 0x29e   : > { %s1898_s9 = smov 1024   ;;  %s1899_s4 = smov 2048  }
 0x29f   : > { %1485 = sst [smem:[#allocation17]] (%p2141_p3), %s1898_s9  ;;  %s1900_s18 = smov 8  }
 0x2a0   : > { %1486 = sst [smem:[#allocation17 + $0x1]] (%p2141_p3), %s1899_s4  ;;  %s1901_s27 = smov 128  }
 0x2a1   : > { %1487 = sst [smem:[#allocation17 + $0x2]] (%p2141_p3), %s1900_s18  ;;  %s1902_s11 = smov [#allocation16]  }
 0x2a2   : > { %s1370_s17 = sshll.u32 %s2630_s5, 6  ;;  %1488 = sst [smem:[#allocation17 + $0x3]] (%p2141_p3), %s1901_s27 }
 0x2a3   : > { %s1000_s6 = sadd.s32 %s1370_s17, %s1369_s22  ;;  %1489 = sst [smem:[#allocation17 + $0x4]] (%p2141_p3), %s1901_s27 }
 0x2a4   : > { %s1371_s19 = sshll.u32 %s1000_s6, 7  ;;  %1490 = sst [smem:[#allocation17 + $0x5]] (%p2141_p3), %s1900_s18 }
 0x2a5   : > { %s1002_s7 = scalar_lea.hbm %s2631_s13, %s1371_s19  ;;  %s1903_s24 = smov 0  }
 0x2a6   : > { %1491 = dma.general (%p2141_p3), %s1020_s2, 4096, %s1002_s7, %s983_s15, %s1902_s11, [#allocation17], %s1903_s24, 0  }
 0x2a7   : > { %s2632_s17 = sld [smem:[#allocation35_spill]]  ;;  %s1066_s21 = sshll.u32 %s2334_s20, 4  ;;  %s1067_s21 = int_to_ptr.vmem [resolvable:$true] %s1066_s21 }
 0x2a8   : > { %s1904_s14 = smov 1024   ;;  %s1905_s13 = smov 2048  }
 0x2a9   : > { %1492 = sst [smem:[#allocation19]] (%p2141_p3), %s1904_s14  ;;  %s1906_s15 = smov 8  }
 0x2aa   : > { %1493 = sst [smem:[#allocation19 + $0x1]] (%p2141_p3), %s1905_s13  ;;  %s1907_s2 = smov 128  }
 0x2ab   : > { %1494 = sst [smem:[#allocation19 + $0x2]] (%p2141_p3), %s1906_s15  ;;  %s1908_s7 = smov [#allocation18]  }
 0x2ac   : > { %1495 = sst [smem:[#allocation19 + $0x3]] (%p2141_p3), %s1907_s2 }
 0x2ad   : > { %s1049_s6 = scalar_lea.hbm %s2632_s17, %s1371_s19  ;;  %1496 = sst [smem:[#allocation19 + $0x4]] (%p2141_p3), %s1907_s2 }
 0x2ae   : > { %1497 = sst [smem:[#allocation19 + $0x5]] (%p2141_p3), %s1906_s15  ;;  %s1909_s19 = smov 0  }
 0x2af   : > { %1498 = dma.general (%p2141_p3), %s1067_s21, 4096, %s1049_s6, %s988_s3, %s1908_s7, [#allocation19], %s1909_s19, 0  }
 0x2b0 PF: > { %s2633_s20 = sld [smem:[#allocation27_spill]]  ;;  %s2634_s9 = sld [smem:[#allocation29_spill]] }
 0x2b1   : > { %p1537_p2 = scmp.ge.s32.totalorder %s1885_s8, 2 }
 0x2b6   : > { %s1094_s4 = sand.u32 1, %s2633_s20   ;;  %p2635_p6 = scmp.ne.s32.totalorder %s2634_s9, 0 }
 0x2b7   : > { %s1095_s18 = scalar_lea.sflag [#allocation4], %s1094_s4 }
 0x2b8   : > { %p1522_p0 = pnand %p1537_p2, %p2635_p6 }
 0x2ba   : > { %1848 = dma.done.wait (!%p1522_p0), %s1095_s18, 4096  }
 0x2bb   : > { %1850 = vsyncadd (!%p1522_p0), %s1095_s18, 4294963200  ;;  %s1104_s27 = scalar_lea.sflag [#allocation15], %s1094_s4 }
 0x2bc   : > { %1852 = dma.done.wait (!%p1522_p0), %s1104_s27, 4096  }
 0x2bd   : > { %1854 = vsyncadd (!%p1522_p0), %s1104_s27, 4294963200  ;;  %s32_s8 = sadd.s32 1, %s1885_s8   ;;  %s2636_s24 = smov %s1861_s25 }
 0x2be   : > { %p29_p5 = scmp.ge.s32.totalorder %s32_s8, 6   ;;  %s2637_s25 = smov %s1865_s26 }
 0x2bf   : > { %s2638_s26 = smov %s2154_s23  ;;  %s2639_s27 = smov %s1877_s29 }
 0x2c0   : > { %s2640_s28 = smov %s1881_s30  ;;  %s2641_s29 = smov %s2644_s12 }
 0x2c1   : > { %s2642_s30 = smov %s2648_s10  ;;  %31 = sbr.rel (!%p29_p5) target bundleno = 20 (0x14), region = 151 }
 0x2c8   :  { %1109 = vsyncpa [#allocation3], 1 }
 0x2c9   :  { %1111 = vsyncpa [#allocation3 + $0x1], 1 }
 0x2ca   :  { %1112 = vsyncpa [#allocation6], 1 }
 0x2cb   :  { %1114 = vsyncpa [#allocation6 + $0x1], 1 }
 0x2cc   :  { %1115 = vsyncpa [#allocation9], 1 }
 0x2cd   :  { %1116 = vsyncpa [#allocation12], 1 }
 0x2ce   :  { %1117 = vsyncpa [#allocation4], 1 }
 0x2cf   :  { %1119 = vsyncpa [#allocation4 + $0x1], 1 }
 0x2d0   :  { %1120 = vsyncpa [#allocation15], 1 }
 0x2d1   :  { %1122 = vsyncpa [#allocation15 + $0x1], 1 }

</bundles_post_ra>
